<compile_context>
chip_gen: v7x
topology: tpu7x:2x2x1
jax: 0.10.0
libtpu: 0.0.40
codegen_flags: <defaults>
</compile_context>

<pallas_src>
import math
import functools

import jax
import jax.numpy as jnp
from jax.experimental import pallas as pl
from jax.experimental.pallas import tpu as pltpu


# ----------------------------------------------------------------------------
# Row-tiled linear kernel: y = x @ W + b   (bf16 MXU operands, f32 accumulate).
# Only used for the relative-position projection r_head_k = r @ Wr + br.
# ----------------------------------------------------------------------------
def _linear_kernel(x_ref, w_ref, b_ref, o_ref):
    acc = jnp.dot(x_ref[...].astype(jnp.bfloat16), w_ref[...],
                  preferred_element_type=jnp.float32)
    o_ref[...] = (acc + b_ref[...]).astype(o_ref.dtype)


def pallas_linear(x2d, w_bf16, b, *, block_m=256, out_dtype=jnp.bfloat16):
    M, K = x2d.shape
    N = w_bf16.shape[1]
    bm = min(block_m, M)
    # TODO(synk): add K/N grid tiling + f32 VMEM accumulator for large hidden sizes.
    return pl.pallas_call(
        _linear_kernel,
        out_shape=jax.ShapeDtypeStruct((M, N), out_dtype),
        grid=(pl.cdiv(M, bm),),
        in_specs=[
            pl.BlockSpec((bm, K), lambda i: (i, 0)),
            pl.BlockSpec((K, N), lambda i: (0, 0)),
            pl.BlockSpec((1, N), lambda i: (0, 0)),
        ],
        out_specs=pl.BlockSpec((bm, N), lambda i: (i, 0)),
        compiler_params=pltpu.CompilerParams(dimension_semantics=("parallel",)),
    )(x2d, w_bf16, b.reshape(1, N).astype(jnp.float32))


# ----------------------------------------------------------------------------
# Fused relative attention kernel: one grid step == one batch element.
#   QKV projection + AC/BD scores + vectorized rel_shift + mask + softmax +
#   probs@V + single full-K output projection, all in VMEM.
# ----------------------------------------------------------------------------
def _fused_relattn_kernel(cat_ref, wqkv_ref, bqkv_ref, r_ref, rwb_ref, rrb_ref,
                          wo_ref, bo_ref, mask_ref, o_ref, *,
                          n_head, d_head, qlen, klen, hidden):
    """
    cat_ref  : (1, klen, hidden)  bf16  [memory ; current] hidden states (this batch)
    wqkv_ref : (hidden, 3*hidden) bf16  fused Wq|Wk|Wv           (VMEM resident)
    bqkv_ref : (1, 3*hidden)      f32   fused bq|bk|bv           (resident)
    r_ref    : (klen, hidden)     bf16  projected rel-pos emb    (resident)
    rwb_ref  : (1, hidden)        f32   r_w_bias head-major flat (resident)
    rrb_ref  : (1, hidden)        f32   r_r_bias head-major flat (resident)
    wo_ref   : (hidden, hidden)   bf16  output projection weight (resident)
    bo_ref   : (1, hidden)        f32   output projection bias   (resident)
    mask_ref : (1, 1, klen)       f32   1.0 = attend, 0.0 = masked
    o_ref    : (1, qlen, hidden)  f32   projected output (lane-dense last dim)
    """
    mlen = klen - qlen
    inv_sqrt_d = 1.0 / math.sqrt(d_head)
    dn = (((1,), (1,)), ((), ()))        # contract last dims: (q,d)x(k,d) -> (q,k)

    # Fused Q/K/V projection for this batch element (no HBM round trip).
    qkv = jnp.dot(cat_ref[0], wqkv_ref[...],
                  preferred_element_type=jnp.float32) + bqkv_ref[...]   # (klen, 3h) f32
    # q = q(cat)[-qlen:, :]; demo mlen is a multiple of 8 so the row slice is
    # sublane aligned (for arbitrary mlen it still works, just with a relayout).
    q = qkv[mlen:, 0:hidden]                                            # (qlen, hidden)
    k = qkv[:, hidden:2 * hidden].astype(jnp.bfloat16)                  # (klen, hidden)
    v = qkv[:, 2 * hidden:3 * hidden].astype(jnp.bfloat16)              # (klen, hidden)
    r = r_ref[...]                                                      # (klen, hidden) bf16

    # Fold 1/sqrt(d_head) into the queries: O(q*hidden) VPU muls instead of O(n*q*k).
    q_rw = ((q + rwb_ref[...]) * inv_sqrt_d).astype(jnp.bfloat16)
    q_rr = ((q + rrb_ref[...]) * inv_sqrt_d).astype(jnp.bfloat16)

    keep = mask_ref[0] != 0.0                                           # (1, klen)
    row = jax.lax.broadcasted_iota(jnp.int32, (qlen, klen), 0)
    col = jax.lax.broadcasted_iota(jnp.int32, (qlen, klen), 1)
    boundary = mlen + 1 + row            # injected zero-column position per row

    ctx_heads = []
    for h in range(n_head):              # static unroll over heads (heads = lane slices)
        sl = slice(h * d_head, (h + 1) * d_head)
        ac = jax.lax.dot_general(q_rw[:, sl], k[:, sl], dn,
                                 preferred_element_type=jnp.float32)   # (q, k)
        bd = jax.lax.dot_general(q_rr[:, sl], r[:, sl], dn,
                                 preferred_element_type=jnp.float32)   # (q, k)

        # Vectorized transformer-xl rel_shift. It matches the pad/reshape/slice
        # reference exactly, incl. the zero column and the "wrap" tail from row i+1:
        #   result[i, j] = bd[i, qlen-1-i+j]      for j <= mlen+i
        #                = 0                      for j == mlen+i+1
        #                = bd[i+1, j-mlen-i-2]    for j >= mlen+i+2
        # a_part[i, j] = bd[i, (j - (mlen+1+i)) mod klen]  (per-row lane rotate, XLU)
        # b_part[i, j] = a_part[i+1, j]                    (one sublane shift)
        a_part = pltpu.roll(bd, mlen, axis=1, stride=1, stride_axis=0)  # shift mlen+i
        a_part = jnp.roll(a_part, 1, axis=1)                            # +1 (static)
        b_part = jnp.roll(a_part, -1, axis=0)                           # row i -> i+1
        bd_shift = jnp.where(col < boundary, a_part,
                             jnp.where(col == boundary, 0.0, b_part))

        scores = jnp.where(keep, ac + bd_shift, -1e30)                  # masked_fill
        mx = jnp.max(scores, axis=-1, keepdims=True)
        e = jnp.exp(scores - mx)
        probs = e * pl.reciprocal(jnp.sum(e, axis=-1, keepdims=True), approx=True)
        ctx_heads.append(
            jnp.dot(probs.astype(jnp.bfloat16), v[:, sl],
                    preferred_element_type=jnp.float32))                # (q, d_head)

    # Single full-K output projection: one (qlen,hidden)@(hidden,hidden) MXU matmul.
    ctx = jnp.concatenate(ctx_heads, axis=-1).astype(jnp.bfloat16)      # (q, hidden)
    out = jnp.dot(ctx, wo_ref[...], preferred_element_type=jnp.float32) + bo_ref[...]
    o_ref[0] = out.astype(o_ref.dtype)


# ----------------------------------------------------------------------------
# Full forward matching TransformerxlMultiHeadAttn.forward(w, cat, r, mask)
# ----------------------------------------------------------------------------
def transformerxl_mha_forward(params, w, cat, r, attention_mask):
    n_head = params["n_head"]
    d_head = params["d_head"]
    hidden = params["hidden"]
    assert hidden == n_head * d_head

    bsz, qlen, _ = w.shape
    klen = cat.shape[1]
    rlen = r.shape[0]
    assert rlen == klen, "transformer-xl rel attention expects rlen == klen"

    bf16 = jnp.bfloat16
    # Fused Q/K/V weights (bf16 MXU operands), projected in-kernel.
    w_qkv = jnp.concatenate([params["Wq"], params["Wk"], params["Wv"]], axis=1).astype(bf16)
    b_qkv = jnp.concatenate([params["bq"], params["bk"], params["bv"]]).reshape(1, 3 * hidden)

    # Relative-position projection (shared across all batch grid steps, bf16).
    r_head_k = pallas_linear(r, params["Wr"].astype(bf16), params["br"])    # (rlen, hidden)

    mask = attention_mask.reshape(bsz, 1, klen).astype(jnp.float32)

    kernel = functools.partial(
        _fused_relattn_kernel, n_head=n_head, d_head=d_head,
        qlen=qlen, klen=klen, hidden=hidden)

    out = pl.pallas_call(
        kernel,
        out_shape=jax.ShapeDtypeStruct((bsz, qlen, hidden), jnp.float32),
        grid=(bsz,),
        in_specs=[
            pl.BlockSpec((1, klen, hidden), lambda b: (b, 0, 0)),       # cat (bf16)
            pl.BlockSpec((hidden, 3 * hidden), lambda b: (0, 0)),       # Wqkv (resident)
            pl.BlockSpec((1, 3 * hidden), lambda b: (0, 0)),            # bqkv
            pl.BlockSpec((klen, hidden), lambda b: (0, 0)),             # r_head_k (resident)
            pl.BlockSpec((1, hidden), lambda b: (0, 0)),                # r_w_bias
            pl.BlockSpec((1, hidden), lambda b: (0, 0)),                # r_r_bias
            pl.BlockSpec((hidden, hidden), lambda b: (0, 0)),           # Wo (resident)
            pl.BlockSpec((1, hidden), lambda b: (0, 0)),                # bo
            pl.BlockSpec((1, 1, klen), lambda b: (b, 0, 0)),            # mask
        ],
        out_specs=pl.BlockSpec((1, qlen, hidden), lambda b: (b, 0, 0)),
        compiler_params=pltpu.CompilerParams(dimension_semantics=("parallel",)),
    )(cat.astype(bf16), w_qkv, b_qkv.astype(jnp.float32), r_head_k,
      params["r_w_bias"].reshape(1, hidden).astype(jnp.float32),
      params["r_r_bias"].reshape(1, hidden).astype(jnp.float32),
      params["Wo"].astype(bf16), params["bo"].reshape(1, hidden).astype(jnp.float32),
      mask)

    # TODO(synk): seg_embed / r_s_bias path (segment_vocab_size > 0), attention-probs
    # dropout (>0 in training), output_attentions return, and flash-style klen tiling
    # (+ explicit vmem_limit_bytes / single-buffered residents) for long sequences on
    # v7x are not exercised here.
    return out


# ----------------------------------------------------------------------------
# Pure-JAX reference (mirrors the PyTorch code) for a correctness check
# ----------------------------------------------------------------------------
def rel_shift(x):
    b, n, q_len, k_len = x.shape
    zero_pad = jnp.zeros((b, n, q_len, 1), x.dtype)
    x_padded = jnp.concatenate([zero_pad, x], axis=-1)
    x_padded = x_padded.reshape(b, n, k_len + 1, q_len)
    return x_padded[:, :, 1:, :].reshape(b, n, q_len, k_len)


def reference_forward(params, w, cat, r, attention_mask):
    n_head = params["n_head"]
    d_head = params["d_head"]
    hidden = params["hidden"]
    bsz, qlen, _ = w.shape
    klen = cat.shape[1]
    rlen = r.shape[0]

    mixed_q = (cat @ params["Wq"] + params["bq"])[:, -qlen:, :]
    mixed_k = cat @ params["Wk"] + params["bk"]
    mixed_v = cat @ params["Wv"] + params["bv"]
    r_head_k = (r @ params["Wr"] + params["br"]).reshape(rlen, n_head, d_head)

    w_head_q = mixed_q.reshape(bsz, qlen, n_head, d_head).transpose(0, 2, 1, 3)
    w_head_k = mixed_k.reshape(bsz, klen, n_head, d_head).transpose(0, 2, 1, 3)
    w_head_v = mixed_v.reshape(bsz, klen, n_head, d_head).transpose(0, 2, 1, 3)

    rw_head_q = w_head_q + params["r_w_bias"][:, None, :]
    AC = jnp.einsum("bnid,bnjd->bnij", rw_head_q, w_head_k)
    rr_head_q = w_head_q + params["r_r_bias"][:, None, :]
    BD = jnp.einsum("bnid,jnd->bnij", rr_head_q, r_head_k)
    BD = rel_shift(BD)

    scores = (AC + BD) / math.sqrt(d_head)
    inv_mask = 1.0 - attention_mask
    scores = jnp.where(inv_mask.astype(bool), -1e30, scores)
    probs = jax.nn.softmax(scores, axis=-1)
    ctx = jnp.einsum("bnij,bnjd->bnid", probs, w_head_v)
    ctx = ctx.transpose(0, 2, 1, 3).reshape(bsz, qlen, hidden)
    return ctx @ params["Wo"] + params["bo"]


# ----------------------------------------------------------------------------
# main
# ----------------------------------------------------------------------------
if __name__ == "__main__":
    # Small, (8,128)-aligned TransformerXL-style shapes.
    bsz, qlen, mlen = 2, 120, 8
    klen = qlen + mlen            # cat = [memory ; current]
    rlen = klen                   # relative positions
    hidden = 128
    n_head = 4
    d_head = hidden // n_head

    key = jax.random.PRNGKey(0)
    ks = jax.random.split(key, 16)

    def winit(k, shape, scale=0.02):
        return (scale * jax.random.normal(k, shape)).astype(jnp.float32)

    params = {
        "hidden": hidden, "n_head": n_head, "d_head": d_head,
        "Wq": winit(ks[0], (hidden, n_head * d_head)), "bq": winit(ks[1], (n_head * d_head,)),
        "Wk": winit(ks[2], (hidden, n_head * d_head)), "bk": winit(ks[3], (n_head * d_head,)),
        "Wv": winit(ks[4], (hidden, n_head * d_head)), "bv": winit(ks[5], (n_head * d_head,)),
        "Wo": winit(ks[6], (n_head * d_head, hidden)), "bo": winit(ks[7], (hidden,)),
        "Wr": winit(ks[8], (hidden, hidden)),           "br": winit(ks[9], (hidden,)),
        "r_w_bias": winit(ks[10], (n_head, d_head), scale=0.1),
        "r_r_bias": winit(ks[11], (n_head, d_head), scale=0.1),
    }

    w = jax.random.normal(ks[12], (bsz, qlen, hidden), dtype=jnp.float32)
    mem = jax.random.normal(ks[13], (bsz, mlen, hidden), dtype=jnp.float32)
    cat = jnp.concatenate([mem, w], axis=1)                        # (bsz, klen, hidden)
    r = jax.random.normal(ks[14], (rlen, hidden), dtype=jnp.float32)

    # padding-style mask: 1 = attend, 0 = masked. Batch 1 masks its last 2 keys.
    attention_mask = jnp.ones((bsz, 1, 1, klen), dtype=jnp.float32)
    attention_mask = attention_mask.at[1, :, :, -2:].set(0.0)

    out = transformerxl_mha_forward(params, w, cat, r, attention_mask)
    out = jax.block_until_ready(out)

    ref = reference_forward(params, w, cat, r, attention_mask)
    assert out.shape == (bsz, qlen, hidden)
    max_err = float(jnp.max(jnp.abs(out - ref)))
    assert jnp.allclose(out, ref, rtol=1e-2, atol=1e-2), f"mismatch vs reference, max_err={max_err}"

    print("KERNEL_OK")
</pallas_src>

<mosaic_0001>
module attributes {stable_mosaic.version = 11 : i64} {
  func.func @_linear_kernel(%arg0: i32, %arg1: memref<128x128xf32, #tpu.memory_space<vmem>>, %arg2: memref<128x128xbf16, #tpu.memory_space<vmem>>, %arg3: memref<1x128xf32, #tpu.memory_space<vmem>>, %arg4: memref<128x128xbf16, #tpu.memory_space<vmem>>) attributes {dimension_semantics = [#tpu.dimension_semantics<parallel>], iteration_bounds = array<i64: 1>, scalar_prefetch = 0 : i64, scratch_operands = 0 : i64, tpu.core_type = #tpu.core_type<tc>, window_params = [{transform_indices = @transform_0, window_bounds = array<i64: 128, 128>}, {pipeline_mode = #tpu.pipeline_mode<synchronous>, transform_indices = @transform_1, window_bounds = array<i64: 128, 128>}, {pipeline_mode = #tpu.pipeline_mode<synchronous>, transform_indices = @transform_2, window_bounds = array<i64: 1, 128>}, {transform_indices = @transform_3, window_bounds = array<i64: 128, 128>}]} {
    %c0 = arith.constant 0 : index
    %c0_0 = arith.constant 0 : index
    %0 = vector.load %arg1[%c0, %c0_0] : memref<128x128xf32, #tpu.memory_space<vmem>>, vector<128x128xf32>
    %1 = arith.truncf %0 : vector<128x128xf32> to vector<128x128xbf16>
    %c0_1 = arith.constant 0 : index
    %c0_2 = arith.constant 0 : index
    %2 = vector.load %arg2[%c0_1, %c0_2] : memref<128x128xbf16, #tpu.memory_space<vmem>>, vector<128x128xbf16>
    %cst = arith.constant dense<0.000000e+00> : vector<128x128xf32>
    %3 = tpu.matmul %1, %2, %cst {dimension_numbers = #tpu.dot_dimension_numbers<[1], [0], [0], [1], [0, 0, 1, 1], [], []>} : vector<128x128xbf16>, vector<128x128xbf16>, vector<128x128xf32> -> vector<128x128xf32>
    %c0_3 = arith.constant 0 : index
    %c0_4 = arith.constant 0 : index
    %4 = vector.load %arg3[%c0_3, %c0_4] : memref<1x128xf32, #tpu.memory_space<vmem>>, vector<1x128xf32>
    %5 = vector.broadcast %4 : vector<1x128xf32> to vector<128x128xf32>
    %6 = arith.addf %3, %5 : vector<128x128xf32>
    %7 = arith.truncf %6 : vector<128x128xf32> to vector<128x128xbf16>
    %c0_5 = arith.constant 0 : index
    %c0_6 = arith.constant 0 : index
    %8 = vector.load %arg4[%c0_5, %c0_6] : memref<128x128xbf16, #tpu.memory_space<vmem>>, vector<128x128xbf16>
    tpu.vector_store %arg4[%c0_5, %c0_6], %7 {strides = array<i32>} : memref<128x128xbf16, #tpu.memory_space<vmem>>, vector<128x128xbf16>,
    return
  }
  func.func @transform_0(%arg0: i32) -> (i32, i32) {
    %c0_i32 = arith.constant 0 : i32
    %c0_i32_0 = arith.constant 0 : i32
    return %arg0, %c0_i32 : i32, i32
  }
  func.func @transform_1(%arg0: i32) -> (i32, i32) {
    %c0_i32 = arith.constant 0 : i32
    %c0_i32_0 = arith.constant 0 : i32
    %c0_i32_1 = arith.constant 0 : i32
    return %c0_i32, %c0_i32_0 : i32, i32
  }
  func.func @transform_2(%arg0: i32) -> (i32, i32) {
    %c0_i32 = arith.constant 0 : i32
    %c0_i32_0 = arith.constant 0 : i32
    %c0_i32_1 = arith.constant 0 : i32
    return %c0_i32, %c0_i32_0 : i32, i32
  }
  func.func @transform_3(%arg0: i32) -> (i32, i32) {
    %c0_i32 = arith.constant 0 : i32
    %c0_i32_0 = arith.constant 0 : i32
    return %arg0, %c0_i32 : i32, i32
  }
}

</mosaic_0001>

<bundles_post_ra>
// kernel: tpu_custom_call.1
= control target key start
LH: loop header
LB: loop body
LE: loop exit
PB: predicated region body
PF: predicated region fallthrough
CT: control target
= control target key end

     0   :  { %8 = vsyncpa [#allocation3], 0  ;;  %s645_s0 = inlined_call_operand.hbm [shape: f32[128,128], index: 0, kind: input, shape index: {}]   ;;  %s646_s1 = inlined_call_operand.hbm [shape: bf16[128,128], index: 1, kind: input, shape index: {}]   ;;  %s647_s2 = inlined_call_operand.vmem [shape: f32[1,128], index: 2, kind: input, shape index: {}]   ;;  %s648_s3 = inlined_call_operand.hbm [shape: bf16[128,128], index: 3, kind: output, shape index: {}]  }
   0x1   :  { %9 = vsyncpa [#allocation6], 0 }
   0x2   :  { %10 = vsyncpa [#allocation4], 0  ;;  %s573_s12 = smov [#allocation2]   ;;  %s501_s16 = scalar_lea.hbm %s645_s0, 2048 }
   0x3   :  { %s16_s13 = sshll.u32 %s573_s12, 4  ;;  %p502_p0 = scmp.ne.s32.totalorder %s645_s0, %s501_s16  ;;  %s17_s13 = int_to_ptr.vmem [resolvable:$true] %s16_s13 }
   0x4   :  { %p505_p1 = scmp.lt.u32.totalorder %s501_s16, %s645_s0 }
   0x6   :  { %p507_p2 = pnand %p505_p1, %p502_p0 }
   0x8   :  { %510 = shalt.err (!%p507_p2)
}
   0x9   :  { %s511_s21 = scalar_lea.vmem %s17_s13, 2048  ;;  %p516_p4 = scmp.lt.s32.totalorder %s17_s13, %s17_s13 }
   0xa   :  { %p512_p3 = scmp.ne.s32.totalorder %s17_s13, %s511_s21  ;;  %p517_p5 = scmp.lt.s32.totalorder %s511_s21, %s511_s21 }
   0xc   :  { %p518_p6 = por %p517_p5, %p516_p4 }
   0xe   :  { %p519_p7 = pnand %p518_p6, %p512_p3 }
  0x10   :  { %522 = shalt.err (!%p519_p7)
}
  0x11   :  { %s574_s22 = smov 128   ;;  %s575_s23 = smov 8  }
  0x12   :  { %22 = dma.hbm_to_vmem [thread:$0]  %s645_s0, 2048, %s17_s13, [#allocation3], %s574_s22, %s574_s22, %s575_s23  }
  0x13   :  { %s576_s26 = smov [#allocation5]   ;;  %s523_s30 = scalar_lea.hbm %s646_s1, 1024 }
  0x14   :  { %s28_s27 = sshll.u32 %s576_s26, 4  ;;  %p524_p8 = scmp.ne.s32.totalorder %s646_s1, %s523_s30  ;;  %s29_s27 = int_to_ptr.vmem [resolvable:$true] %s28_s27 }
  0x15   :  { %p527_p9 = scmp.lt.u32.totalorder %s523_s30, %s646_s1 }
  0x17   :  { %p529_p10 = pnand %p527_p9, %p524_p8 }
  0x19   :  { %532 = shalt.err (!%p529_p10)
}
  0x1a   :  { %s533_s8 = scalar_lea.vmem %s29_s27, 1024  ;;  %p538_p12 = scmp.lt.s32.totalorder %s29_s27, %s29_s27 }
  0x1b   :  { %p534_p11 = scmp.ne.s32.totalorder %s29_s27, %s533_s8  ;;  %p539_p13 = scmp.lt.s32.totalorder %s533_s8, %s533_s8 }
  0x1d   :  { %p540_p0 = por %p539_p13, %p538_p12 }
  0x1f   :  { %p541_p1 = pnand %p540_p0, %p534_p11 }
  0x21   :  { %544 = shalt.err (!%p541_p1)
}
  0x22   :  { %s577_s0 = smov 64   ;;  %s578_s9 = smov 4  }
  0x23   :  { %34 = dma.hbm_to_vmem [thread:$0]  %s646_s1, 1024, %s29_s27, [#allocation6], %s577_s0, %s577_s0, %s578_s9  }
  0x24   :  { %567 = dma.done.wait [#allocation3], 2048  }
  0x25   :  { %568 = vsyncadd [#allocation3], 4294965248 }
  0x26   :  { %569 = dma.done.wait [#allocation6], 1024  }
  0x27   :  { %570 = vsyncadd [#allocation6], 4294966272  ;;  %v493_v0 = vld [vmem:[#allocation5] sm:$0xff]   ;;  %v494_v1 = vld [vmem:[#allocation5 + $0x8] sm:$0xff]  }
  0x28   :  { %438 = vmatprep.subr.bf16.mxu0 %v493_v0  ;;  %470 = vmatprep.subr.bf16.mxu1 %v493_v0  ;;  %v495_v2 = vld [vmem:[#allocation5 + $0x10] sm:$0xff]   ;;  %v496_v3 = vld [vmem:[#allocation5 + $0x18] sm:$0xff]   ;;  %v44_v4 = vld [vmem:[#allocation2] sm:$0xff] }
  0x29   :  { %439 = vmatpush3.bf16.msra.mxu0 %v493_v0  ;;  %478 = vmatpush3.bf16.msra.mxu1 %v493_v0  ;;  %v45_v5 = vld [vmem:[#allocation2 + $0x8] sm:$0xff]  ;;  %v52_v6 = vld [vmem:[#allocation2 + $0x40] sm:$0xff]  ;;  %v499_v12 = vld [vmem:[#allocation5 + $0x30] sm:$0xff]  }
  0x2a   :  { %440 = vmatprep.subr.bf16.mxu0 %v494_v1  ;;  %471 = vmatprep.subr.bf16.mxu1 %v494_v1  ;;  %v60_v7 = vpack.c.bf16 %v45_v5, %v44_v4  ;;  %v53_v8 = vld [vmem:[#allocation2 + $0x48] sm:$0xff]  ;;  %v497_v10 = vld [vmem:[#allocation5 + $0x20] sm:$0xff]   ;;  %v500_v13 = vld [vmem:[#allocation5 + $0x38] sm:$0xff]  }
  0x2b   :  { %v64_v9 = vpack.c.bf16 %v53_v8, %v52_v6  ;;  %v498_v11 = vld [vmem:[#allocation5 + $0x28] sm:$0xff]   ;;  %v46_v14 = vld [vmem:[#allocation2 + $0x10] sm:$0xff]  ;;  %v47_v15 = vld [vmem:[#allocation2 + $0x18] sm:$0xff] }
  0x2c   :  { %454 = vmatprep.mubr.bf16.mxu0 %v60_v7  ;;  %v54_v16 = vld [vmem:[#allocation2 + $0x50] sm:$0xff]  ;;  %v55_v17 = vld [vmem:[#allocation2 + $0x58] sm:$0xff]  ;;  %v48_v18 = vld [vmem:[#allocation2 + $0x20] sm:$0xff]  ;;  %v61_v22 = vpack.c.bf16 %v47_v15, %v46_v14 }
  0x2d   :  { %441 = vmatpush3.bf16.msra.mxu0 %v494_v1  ;;  %479 = vmatpush3.bf16.msra.mxu1 %v494_v1  ;;  %v49_v19 = vld [vmem:[#allocation2 + $0x28] sm:$0xff]  ;;  %v56_v20 = vld [vmem:[#allocation2 + $0x60] sm:$0xff]  ;;  %v65_v23 = vpack.c.bf16 %v55_v17, %v54_v16  ;;  %v50_v26 = vld [vmem:[#allocation2 + $0x30] sm:$0xff] }
  0x2e   :  { %442 = vmatprep.subr.bf16.mxu0 %v495_v2  ;;  %472 = vmatprep.subr.bf16.mxu1 %v495_v2  ;;  %v57_v21 = vld [vmem:[#allocation2 + $0x68] sm:$0xff]  ;;  %v62_v24 = vpack.c.bf16 %v49_v19, %v48_v18  ;;  %v51_v27 = vld [vmem:[#allocation2 + $0x38] sm:$0xff]  ;;  %v58_v28 = vld [vmem:[#allocation2 + $0x70] sm:$0xff] }
  0x2f   :  { %462 = vmatprep.mubr.bf16.mxu1 %v64_v9  ;;  %v66_v25 = vpack.c.bf16 %v57_v21, %v56_v20  ;;  %v59_v29 = vld [vmem:[#allocation2 + $0x78] sm:$0xff]  ;;  %v63_v30 = vpack.c.bf16 %v51_v27, %v50_v26  ;;  %v334_v33 = vld [vmem:[%s647_s2] ss:$0 sm:$0xff]  ;;  %s579_s2 = smov [#allocation7]  }
  0x30   :  { %v67_v31 = vpack.c.bf16 %v59_v29, %v58_v28  ;;  %s321_s13 = sshll.u32 %s579_s2, 4  ;;  %s322_s13 = int_to_ptr.vmem [resolvable:$true] %s321_s13 }
  0x31   :  { %443 = vmatpush3.bf16.msra.mxu0 %v495_v2  ;;  %480 = vmatpush3.bf16.msra.mxu1 %v495_v2  ;;  %s545_s14 = scalar_lea.vmem %s322_s13, 1024  ;;  %p550_p3 = scmp.lt.s32.totalorder %s322_s13, %s322_s13 }
  0x32   :  { %444 = vmatprep.subr.bf16.mxu0 %v496_v3  ;;  %473 = vmatprep.subr.bf16.mxu1 %v496_v3  ;;  %p546_p2 = scmp.ne.s32.totalorder %s322_s13, %s545_s14  ;;  %p551_p4 = scmp.lt.s32.totalorder %s545_s14, %s545_s14 }
  0x34   :  { %p552_p5 = por %p551_p4, %p550_p3 }
  0x35   :  { %445 = vmatpush3.bf16.msra.mxu0 %v496_v3  ;;  %481 = vmatpush3.bf16.msra.mxu1 %v496_v3 }
  0x36   :  { %446 = vmatprep.subr.bf16.mxu0 %v497_v10  ;;  %474 = vmatprep.subr.bf16.mxu1 %v497_v10  ;;  %p553_p6 = pnand %p552_p5, %p546_p2 }
  0x39   :  { %447 = vmatpush3.bf16.msra.mxu0 %v497_v10  ;;  %482 = vmatpush3.bf16.msra.mxu1 %v497_v10 }
  0x3a   :  { %448 = vmatprep.subr.bf16.mxu0 %v498_v11  ;;  %475 = vmatprep.subr.bf16.mxu1 %v498_v11 }
  0x3d   :  { %449 = vmatpush3.bf16.msra.mxu0 %v498_v11  ;;  %483 = vmatpush3.bf16.msra.mxu1 %v498_v11 }
  0x3e   :  { %450 = vmatprep.subr.bf16.mxu0 %v499_v12  ;;  %476 = vmatprep.subr.bf16.mxu1 %v499_v12 }
  0x41   :  { %451 = vmatpush3.bf16.msra.mxu0 %v499_v12  ;;  %484 = vmatpush3.bf16.msra.mxu1 %v499_v12 }
  0x42   :  { %452 = vmatprep.subr.bf16.mxu0 %v500_v13  ;;  %477 = vmatprep.subr.bf16.mxu1 %v500_v13 }
  0x45   :  { %453 = vmatpush3.bf16.msra.mxu0 %v500_v13  ;;  %485 = vmatpush3.bf16.msra.mxu1 %v500_v13 }
  0x48   :  { %455 = vmatmul.mubr.bf16.vlgmr.msra.gmra.mrb[0].mxu0 %v61_v22  ;;  %463 = vmatmul.mubr.bf16.vlgmr.msra.gmra.mrb[0].mxu1 %v65_v23 }
  0x49   :  { %458 = vmatprep.mubr.bf16.mxu0 %v62_v24  ;;  %466 = vmatprep.mubr.bf16.mxu1 %v66_v25 }
  0x50   :  { %459 = vmatmul.mubr.bf16.gmra.mrb[4].mxu0 %v63_v30  ;;  %467 = vmatmul.mubr.bf16.gmra.mrb[4].mxu1 %v67_v31 }
 0x11b   :  { %v456_v32 = vpop.f32.mrb[0].mxu0  ;;  %v464_v34 = vpop.f32.mrb[0].mxu1 }
 0x11c   :  { %v173_v35 = vpop.f32.mrb[1].mxu0  ;;  %v205_v36 = vpop.f32.mrb[1].mxu1  ;;  %v182_v39 = vadd.f32 %v456_v32, %v334_v33  ;;  %v214_v40 = vadd.f32 %v464_v34, %v334_v33 }
 0x11d   :  { %v457_v37 = vpop.f32.mrb[2].mxu0  ;;  %v465_v38 = vpop.f32.mrb[2].mxu1  ;;  %v174_v45 = vadd.f32 %v334_v33, %v173_v35  ;;  %v206_v46 = vadd.f32 %v334_v33, %v205_v36 }
 0x11e   :  { %v185_v41 = vadd.f32 %v457_v37, %v334_v33  ;;  %v217_v42 = vadd.f32 %v465_v38, %v334_v33  ;;  %v176_v43 = vpop.f32.mrb[3].mxu0  ;;  %v208_v44 = vpop.f32.mrb[3].mxu1 }
 0x11f   :  { %v177_v47 = vadd.f32 %v334_v33, %v176_v43  ;;  %v209_v48 = vadd.f32 %v334_v33, %v208_v44 }
 0x120   :  { %v383_v49 = vpack.c.bf16 %v185_v41, %v182_v39  ;;  %v403_v50 = vpack.c.bf16 %v217_v42, %v214_v40 }
 0x121   :  { %v378_v51 = vpack.c.bf16 %v177_v47, %v174_v45  ;;  %v398_v52 = vpack.c.bf16 %v209_v48, %v206_v46 }
 0x122   :  { %415 = vst [vmem:[#allocation7 + $0x8] sm:$0xff] %v383_v49   ;;  %419 = vst [vmem:[#allocation7 + $0x28] sm:$0xff] %v403_v50  }
 0x123   :  { %379 = vst [vmem:[#allocation7] sm:$0xff] %v378_v51   ;;  %418 = vst [vmem:[#allocation7 + $0x20] sm:$0xff] %v398_v52   ;;  %v460_v53 = vpop.f32.mrb[4].mxu0  ;;  %v468_v54 = vpop.f32.mrb[4].mxu1 }
 0x124   :  { %v189_v55 = vpop.f32.mrb[5].mxu0  ;;  %v221_v56 = vpop.f32.mrb[5].mxu1  ;;  %v198_v59 = vadd.f32 %v460_v53, %v334_v33  ;;  %v230_v60 = vadd.f32 %v468_v54, %v334_v33 }
 0x125   :  { %v461_v57 = vpop.f32.mrb[6].mxu0  ;;  %v469_v58 = vpop.f32.mrb[6].mxu1  ;;  %v190_v1 = vadd.f32 %v334_v33, %v189_v55  ;;  %v222_v2 = vadd.f32 %v334_v33, %v221_v56 }
 0x126   :  { %v201_v61 = vadd.f32 %v461_v57, %v334_v33  ;;  %v233_v62 = vadd.f32 %v469_v58, %v334_v33  ;;  %v192_v63 = vpop.f32.mrb[7].mxu0  ;;  %v224_v0 = vpop.f32.mrb[7].mxu1 }
 0x127   :  { %v193_v3 = vadd.f32 %v334_v33, %v192_v63  ;;  %v225_v4 = vadd.f32 %v334_v33, %v224_v0 }
 0x128   :  { %v393_v5 = vpack.c.bf16 %v201_v61, %v198_v59  ;;  %v413_v6 = vpack.c.bf16 %v233_v62, %v230_v60 }
 0x129   :  { %v388_v7 = vpack.c.bf16 %v193_v3, %v190_v1  ;;  %v408_v8 = vpack.c.bf16 %v225_v4, %v222_v2 }
 0x12a   :  { %417 = vst [vmem:[#allocation7 + $0x18] sm:$0xff] %v393_v5   ;;  %421 = vst [vmem:[#allocation7 + $0x38] sm:$0xff] %v413_v6  }
 0x12b   :  { %416 = vst [vmem:[#allocation7 + $0x10] sm:$0xff] %v388_v7   ;;  %420 = vst [vmem:[#allocation7 + $0x30] sm:$0xff] %v408_v8  }
 0x12c   :  { %556 = shalt.err (!%p553_p6)
}
 0x12d   :  { %s557_s17 = scalar_lea.hbm %s648_s3, 1024 }
 0x12e   :  { %p558_p7 = scmp.ne.s32.totalorder %s648_s3, %s557_s17  ;;  %p561_p8 = scmp.lt.u32.totalorder %s557_s17, %s648_s3 }
 0x130   :  { %p563_p9 = pnand %p561_p8, %p558_p7 }
 0x132   :  { %566 = shalt.err (!%p563_p9)
}
 0x133   :  { %327 = dma.vmem_to_hbm [thread:$0]  %s322_s13, 1024, %s648_s3, [#allocation4], %s577_s0, %s577_s0, %s578_s9  }
 0x134   :  { %571 = dma.done.wait [#allocation4], 1024  }
 0x135   :  { %572 = vsyncadd [#allocation4], 4294966272 }
 0x136   :  { %331 = vsyncpa [#allocation3], 1 }
 0x137   :  { %332 = vsyncpa [#allocation6], 1 }
 0x138   :  { %333 = vsyncpa [#allocation4], 1 }

</bundles_post_ra>
